<compile_context>
chip_gen: v7x
topology: tpu7x:2x2x1
jax: 0.10.0
libtpu: 0.0.40
codegen_flags: <defaults>
</compile_context>

<pallas_src>
import math

import jax
import jax.numpy as jnp
from jax import lax
from jax.experimental import pallas as pl
from jax.experimental.pallas import tpu as pltpu

# ---------------- model hyper-parameters (small, consistent with module) ----
B = 2          # batch
S = 8          # sequence length
D_MODEL = 32   # d_model
NUM_HEADS = 4
D_K = D_MODEL // NUM_HEADS
D_FF = 64
LN_EPS = 1e-6

# rows of the packed small-operand array (one (8,128) f32 tile, one DMA)
_ROW_BQKV, _ROW_BO, _ROW_G1, _ROW_BE1, _ROW_BF1, _ROW_BF2, _ROW_G2, _ROW_BE2 = range(8)


def _layernorm(t, gamma, beta):
    # Matches torch LayerNormalization: unbiased std (divide by d-1) and eps
    # added to std (not variance).  Exact division here — approx reciprocal is
    # reserved for the softmax denominator only (review correctness item).
    mean = jnp.mean(t, axis=-1, keepdims=True)
    var = jnp.sum((t - mean) ** 2, axis=-1, keepdims=True) * (1.0 / (D_MODEL - 1))
    return gamma * (t - mean) / (jnp.sqrt(var) + LN_EPS) + beta


def encoder_layer_kernel(x_ref, bias_ref, wqkv_ref, wo_ref, w1_ref, w2_ref,
                         p_ref, out_ref):
    # one program == one batch element; x is (S, D_MODEL) f32
    x = x_ref[...]

    # ---- packed small operands (static slices of a single VMEM tile) ------
    bqkv = p_ref[_ROW_BQKV:_ROW_BQKV + 1, 0:3 * D_MODEL]
    bo   = p_ref[_ROW_BO:_ROW_BO + 1, 0:D_MODEL]
    g1   = p_ref[_ROW_G1:_ROW_G1 + 1, 0:D_MODEL]
    be1  = p_ref[_ROW_BE1:_ROW_BE1 + 1, 0:D_MODEL]
    bf1  = p_ref[_ROW_BF1:_ROW_BF1 + 1, 0:D_FF]
    bf2  = p_ref[_ROW_BF2:_ROW_BF2 + 1, 0:D_MODEL]
    g2   = p_ref[_ROW_G2:_ROW_G2 + 1, 0:D_MODEL]
    be2  = p_ref[_ROW_BE2:_ROW_BE2 + 1, 0:D_MODEL]

    # ---- fused QKV projection: bf16 MXU operands, f32 accumulation --------
    qkv = jnp.dot(x.astype(jnp.bfloat16), wqkv_ref[...],
                  preferred_element_type=jnp.float32) + bqkv        # (S, 3D) f32

    bias = bias_ref[0]                      # (S, S) additive mask (0 / -1e9)
    scale = 1.0 / math.sqrt(D_K)

    # ---- per-head attention, fully unrolled; merge folded into wo ---------
    attn = jnp.zeros((S, D_MODEL), jnp.float32)
    for h in range(NUM_HEADS):
        qh = qkv[:, h * D_K:(h + 1) * D_K].astype(jnp.bfloat16)
        kh = qkv[:, D_MODEL + h * D_K:D_MODEL + (h + 1) * D_K].astype(jnp.bfloat16)
        vh = qkv[:, 2 * D_MODEL + h * D_K:2 * D_MODEL + (h + 1) * D_K].astype(jnp.bfloat16)

        # scores = qh @ kh^T (contract last dims of both; no materialized .T)
        s = lax.dot_general(qh, kh, (((1,), (1,)), ((), ())),
                            preferred_element_type=jnp.float32) * scale + bias
        s = s - jnp.max(s, axis=-1, keepdims=True)
        e = jnp.exp(s)
        p = e * pl.reciprocal(jnp.sum(e, axis=-1, keepdims=True), approx=True)

        ctx = jnp.dot(p.astype(jnp.bfloat16), vh,
                      preferred_element_type=jnp.float32)           # (S, D_K)
        # head merge == accumulate ctx_h @ wo_h (no lane concat / reshape)
        attn = attn + jnp.dot(ctx.astype(jnp.bfloat16), wo_ref[h],
                              preferred_element_type=jnp.float32)
    attn = attn + bo

    # dropout1 = identity (inference)
    x1 = _layernorm(x + attn, g1, be1)

    # ---- feed forward (bf16 matmul inputs, f32 accumulation) --------------
    h1 = jnp.maximum(
        jnp.dot(x1.astype(jnp.bfloat16), w1_ref[...],
                preferred_element_type=jnp.float32) + bf1, 0.0)
    # dropout inside FeedForward = identity (inference)
    ff = jnp.dot(h1.astype(jnp.bfloat16), w2_ref[...],
                 preferred_element_type=jnp.float32) + bf2

    # dropout2 = identity (inference)
    out_ref[...] = _layernorm(x1 + ff, g2, be2)


def encoder_layer(x, mask, params):
    """x: (B, S, D_MODEL) f32; mask: (B, S, S) f32 (nonzero = masked out)."""
    (wq, bq, wk, bk, wv, bv, wo, bo,
     g1, be1, w1, bf1, w2, bf2, g2, be2) = params

    # Fused + pre-cast weights (one-time XLA work outside the kernel).
    wqkv = jnp.concatenate([wq, wk, wv], axis=1).astype(jnp.bfloat16)   # (D, 3D)
    wo_heads = wo.reshape(NUM_HEADS, D_K, D_MODEL).astype(jnp.bfloat16)  # (H, D_K, D)
    w1_b = w1.astype(jnp.bfloat16)
    w2_b = w2.astype(jnp.bfloat16)
    bqkv = jnp.concatenate([bq, bk, bv], axis=1)                         # (1, 3D)

    # Pack all tiny operands into one lane-padded (8, 128) f32 tile → 1 DMA.
    def row(v):
        v = v.reshape(1, -1).astype(jnp.float32)
        return jnp.pad(v, ((0, 0), (0, 128 - v.shape[1])))
    packed = jnp.concatenate(
        [row(bqkv), row(bo), row(g1), row(be1),
         row(bf1), row(bf2), row(g2), row(be2)], axis=0)                 # (8, 128)

    # Precompute additive mask bias (masked_fill(-1e9) ≡ +(-1e9) post-softmax).
    mask_bias = jnp.where(mask > 0, jnp.float32(-1e9), jnp.float32(0.0))

    x2d = x.reshape(B * S, D_MODEL)   # fold batch into rows; grid slices it

    flops = (2 * B * S * D_MODEL * 3 * D_MODEL                 # qkv proj
             + B * NUM_HEADS * (2 * S * S * D_K) * 2           # scores + ctx
             + B * NUM_HEADS * 2 * S * D_K * D_MODEL           # per-head wo acc
             + 2 * (2 * B * S * D_MODEL * D_FF))               # ffn (both mats)
    bytes_accessed = (2 * B * S * D_MODEL * 4 + B * S * S * 4
                      + (wqkv.size + wo_heads.size + w1_b.size + w2_b.size) * 2
                      + packed.size * 4)
    cost = pl.CostEstimate(flops=flops,
                           transcendentals=B * NUM_HEADS * S * S,
                           bytes_accessed=bytes_accessed)

    out2d = pl.pallas_call(
        encoder_layer_kernel,
        out_shape=jax.ShapeDtypeStruct((B * S, D_MODEL), jnp.float32),
        grid=(B,),
        in_specs=[
            pl.BlockSpec((S, D_MODEL), lambda b: (b, 0)),               # x rows
            pl.BlockSpec((1, S, S), lambda b: (b, 0, 0)),               # mask bias
            pl.BlockSpec((D_MODEL, 3 * D_MODEL), lambda b: (0, 0)),     # wqkv bf16
            pl.BlockSpec((NUM_HEADS, D_K, D_MODEL), lambda b: (0, 0, 0)),  # wo bf16
            pl.BlockSpec((D_MODEL, D_FF), lambda b: (0, 0)),            # w1 bf16
            pl.BlockSpec((D_FF, D_MODEL), lambda b: (0, 0)),            # w2 bf16
            pl.BlockSpec((8, 128), lambda b: (0, 0)),                   # packed params
        ],
        out_specs=pl.BlockSpec((S, D_MODEL), lambda b: (b, 0)),
        compiler_params=pltpu.CompilerParams(
            dimension_semantics=("parallel",),      # v7x: 2nd TensorCore usable
            vmem_limit_bytes=48 * 1024 * 1024),     # headroom for v7x's 64 MiB
        cost_estimate=cost,
    )(x2d, mask_bias, wqkv, wo_heads, w1_b, w2_b, packed)
    return out2d.reshape(B, S, D_MODEL)


# ---------------- deterministic parameter init (torch-style shapes) ---------
def xavier_uniform(key, out_f, in_f):
    limit = math.sqrt(6.0 / (in_f + out_f))
    return jax.random.uniform(key, (out_f, in_f), jnp.float32, -limit, limit)


def linear_bias(key, out_f, in_f):
    bound = 1.0 / math.sqrt(in_f)
    return jax.random.uniform(key, (out_f,), jnp.float32, -bound, bound)


def make_params(key):
    ks = jax.random.split(key, 12)
    # attention projections (torch Linear weight is (out,in); transpose for kernel)
    wq = xavier_uniform(ks[0], D_MODEL, D_MODEL).T
    wk = xavier_uniform(ks[1], D_MODEL, D_MODEL).T
    wv = xavier_uniform(ks[2], D_MODEL, D_MODEL).T
    wo = xavier_uniform(ks[3], D_MODEL, D_MODEL).T
    bq = linear_bias(ks[4], D_MODEL, D_MODEL).reshape(1, D_MODEL)
    bk = linear_bias(ks[5], D_MODEL, D_MODEL).reshape(1, D_MODEL)
    bv = linear_bias(ks[6], D_MODEL, D_MODEL).reshape(1, D_MODEL)
    bo = linear_bias(ks[7], D_MODEL, D_MODEL).reshape(1, D_MODEL)
    # feed forward
    w1 = xavier_uniform(ks[8], D_FF, D_MODEL).T       # (D_MODEL, D_FF)
    bf1 = linear_bias(ks[9], D_FF, D_MODEL).reshape(1, D_FF)
    w2 = xavier_uniform(ks[10], D_MODEL, D_FF).T      # (D_FF, D_MODEL)
    bf2 = linear_bias(ks[11], D_MODEL, D_FF).reshape(1, D_MODEL)
    # layer norms
    g1 = jnp.ones((1, D_MODEL), jnp.float32)
    be1 = jnp.zeros((1, D_MODEL), jnp.float32)
    g2 = jnp.ones((1, D_MODEL), jnp.float32)
    be2 = jnp.zeros((1, D_MODEL), jnp.float32)
    return (wq, bq, wk, bk, wv, bv, wo, bo,
            g1, be1, w1, bf1, w2, bf2, g2, be2)


# ---------------- pure-JAX reference --------------------------------------
# matmul_dtype=float32  -> exact PyTorch-equivalent math.
# matmul_dtype=bfloat16 -> mirrors the kernel's bf16 MXU inputs / f32 accum.
def reference(x, mask, params, matmul_dtype=jnp.float32):
    (wq, bq, wk, bk, wv, bv, wo, bo,
     g1, be1, w1, bf1, w2, bf2, g2, be2) = params

    def mm(a, b):
        return jnp.dot(a.astype(matmul_dtype), b.astype(matmul_dtype),
                       preferred_element_type=jnp.float32)

    def ln(t, g, b_):
        mean = jnp.mean(t, -1, keepdims=True)
        var = jnp.sum((t - mean) ** 2, -1, keepdims=True) / (D_MODEL - 1)
        return g * (t - mean) / (jnp.sqrt(var) + LN_EPS) + b_

    q = (mm(x, wq) + bq).reshape(B, S, NUM_HEADS, D_K).transpose(0, 2, 1, 3)
    k = (mm(x, wk) + bk).reshape(B, S, NUM_HEADS, D_K).transpose(0, 2, 1, 3)
    v = (mm(x, wv) + bv).reshape(B, S, NUM_HEADS, D_K).transpose(0, 2, 1, 3)
    scores = jnp.einsum('bhqd,bhkd->bhqk', q.astype(matmul_dtype),
                        k.astype(matmul_dtype),
                        preferred_element_type=jnp.float32) / math.sqrt(D_K)
    scores = jnp.where(mask[:, None, :, :] > 0, -1e9, scores)
    probs = jax.nn.softmax(scores, axis=-1)
    out = jnp.einsum('bhqk,bhkd->bhqd', probs.astype(matmul_dtype),
                     v.astype(matmul_dtype),
                     preferred_element_type=jnp.float32)
    out = out.transpose(0, 2, 1, 3).reshape(B, S, D_MODEL)
    attn = mm(out, wo) + bo
    x1 = ln(x + attn, g1, be1)
    ff = mm(jnp.maximum(mm(x1, w1) + bf1, 0.0), w2) + bf2
    return ln(x1 + ff, g2, be2)


if __name__ == "__main__":
    key = jax.random.PRNGKey(0)
    kx, kp = jax.random.split(key)
    x = jax.random.normal(kx, (B, S, D_MODEL), jnp.float32)

    # padding mask: last 2 key positions of each sequence are masked out
    mask = jnp.zeros((B, S, S), jnp.float32).at[:, :, S - 2:].set(1.0)

    params = make_params(kp)

    out = jax.jit(encoder_layer)(x, mask, params)
    out = jax.block_until_ready(out)
    assert out.shape == (B, S, D_MODEL)

    # Tight check vs. a reference that mirrors the kernel's bf16-input matmuls
    # (remaining diff: approx reciprocal in softmax + accumulation order).
    ref_bf16 = reference(x, mask, params, matmul_dtype=jnp.bfloat16)
    err_b = float(jnp.max(jnp.abs(out - ref_bf16)))
    assert jnp.allclose(out, ref_bf16, atol=1e-2, rtol=1e-2), err_b

    # Loose sanity check vs. exact-f32 PyTorch-equivalent math: bf16 MXU
    # inputs cost a few 1e-2 absolute; structural bugs would show as O(0.1-1)
    # since the output is layer-normalized.
    ref_f32 = reference(x, mask, params, matmul_dtype=jnp.float32)
    err_f = float(jnp.max(jnp.abs(out - ref_f32)))
    assert jnp.allclose(out, ref_f32, atol=1e-1, rtol=1e-1), err_f

    print("KERNEL_OK")
</pallas_src>

<mosaic_0001>
module attributes {stable_mosaic.version = 11 : i64} {
  func.func @encoder_layer_kernel(%arg0: i32, %arg1: memref<8x32xf32, #tpu.memory_space<vmem>>, %arg2: memref<1x8x8xf32, #tpu.memory_space<vmem>>, %arg3: memref<32x96xbf16, #tpu.memory_space<vmem>>, %arg4: memref<4x8x32xbf16, #tpu.memory_space<vmem>>, %arg5: memref<32x64xbf16, #tpu.memory_space<vmem>>, %arg6: memref<64x32xbf16, #tpu.memory_space<vmem>>, %arg7: memref<8x128xf32, #tpu.memory_space<vmem>>, %arg8: memref<8x32xf32, #tpu.memory_space<vmem>>) attributes {dimension_semantics = [#tpu.dimension_semantics<parallel>], iteration_bounds = array<i64: 2>, scalar_prefetch = 0 : i64, scratch_operands = 0 : i64, tpu.core_type = #tpu.core_type<tc>, window_params = [{transform_indices = @transform_0, window_bounds = array<i64: 8, 32>}, {transform_indices = @transform_1, window_bounds = array<i64: 1, 8, 8>}, {pipeline_mode = #tpu.pipeline_mode<synchronous>, transform_indices = @transform_2, window_bounds = array<i64: 32, 96>}, {pipeline_mode = #tpu.pipeline_mode<synchronous>, transform_indices = @transform_3, window_bounds = array<i64: 4, 8, 32>}, {pipeline_mode = #tpu.pipeline_mode<synchronous>, transform_indices = @transform_4, window_bounds = array<i64: 32, 64>}, {pipeline_mode = #tpu.pipeline_mode<synchronous>, transform_indices = @transform_5, window_bounds = array<i64: 64, 32>}, {pipeline_mode = #tpu.pipeline_mode<synchronous>, transform_indices = @transform_6, window_bounds = array<i64: 8, 128>}, {transform_indices = @transform_7, window_bounds = array<i64: 8, 32>}]} {
    %c0 = arith.constant 0 : index
    %c0_0 = arith.constant 0 : index
    %0 = vector.load %arg1[%c0, %c0_0] : memref<8x32xf32, #tpu.memory_space<vmem>>, vector<8x32xf32>
    %c0_1 = arith.constant 0 : index
    %c0_2 = arith.constant 0 : index
    %1 = vector.load %arg7[%c0_1, %c0_2] : memref<8x128xf32, #tpu.memory_space<vmem>>, vector<1x96xf32>
    %c1 = arith.constant 1 : index
    %c0_3 = arith.constant 0 : index
    %2 = vector.load %arg7[%c1, %c0_3] : memref<8x128xf32, #tpu.memory_space<vmem>>, vector<1x32xf32>
    %c2 = arith.constant 2 : index
    %c0_4 = arith.constant 0 : index
    %3 = vector.load %arg7[%c2, %c0_4] : memref<8x128xf32, #tpu.memory_space<vmem>>, vector<1x32xf32>
    %c3 = arith.constant 3 : index
    %c0_5 = arith.constant 0 : index
    %4 = vector.load %arg7[%c3, %c0_5] : memref<8x128xf32, #tpu.memory_space<vmem>>, vector<1x32xf32>
    %c4 = arith.constant 4 : index
    %c0_6 = arith.constant 0 : index
    %5 = vector.load %arg7[%c4, %c0_6] : memref<8x128xf32, #tpu.memory_space<vmem>>, vector<1x64xf32>
    %c5 = arith.constant 5 : index
    %c0_7 = arith.constant 0 : index
    %6 = vector.load %arg7[%c5, %c0_7] : memref<8x128xf32, #tpu.memory_space<vmem>>, vector<1x32xf32>
    %c6 = arith.constant 6 : index
    %c0_8 = arith.constant 0 : index
    %7 = vector.load %arg7[%c6, %c0_8] : memref<8x128xf32, #tpu.memory_space<vmem>>, vector<1x32xf32>
    %c7 = arith.constant 7 : index
    %c0_9 = arith.constant 0 : index
    %8 = vector.load %arg7[%c7, %c0_9] : memref<8x128xf32, #tpu.memory_space<vmem>>, vector<1x32xf32>
    %9 = arith.truncf %0 : vector<8x32xf32> to vector<8x32xbf16>
    %c0_10 = arith.constant 0 : index
    %c0_11 = arith.constant 0 : index
    %10 = vector.load %arg3[%c0_10, %c0_11] : memref<32x96xbf16, #tpu.memory_space<vmem>>, vector<32x96xbf16>
    %cst = arith.constant dense<0.000000e+00> : vector<8x96xf32>
    %11 = tpu.matmul %9, %10, %cst {dimension_numbers = #tpu.dot_dimension_numbers<[1], [0], [0], [1], [0, 0, 1, 1], [], []>} : vector<8x32xbf16>, vector<32x96xbf16>, vector<8x96xf32> -> vector<8x96xf32>
    %12 = vector.broadcast %1 : vector<1x96xf32> to vector<8x96xf32>
    %13 = arith.addf %11, %12 : vector<8x96xf32>
    %c0_12 = arith.constant 0 : index
    %c0_13 = arith.constant 0 : index
    %c0_14 = arith.constant 0 : index
    %14 = vector.load %arg2[%c0_12, %c0_13, %c0_14] : memref<1x8x8xf32, #tpu.memory_space<vmem>>, vector<1x8x8xf32>
    %15 = vector.shape_cast %14 : vector<1x8x8xf32> to vector<8x8xf32>
    %cst_15 = arith.constant 0.000000e+00 : f32
    %16 = vector.broadcast %cst_15 : f32 to vector<8x32xf32>
    %17 = vector.extract_strided_slice %13 {offsets = [0, 0], sizes = [8, 8], strides = [1, 1]} : vector<8x96xf32> to vector<8x8xf32>
    %18 = arith.truncf %17 : vector<8x8xf32> to vector<8x8xbf16>
    %19 = vector.extract_strided_slice %13 {offsets = [0, 32], sizes = [8, 8], strides = [1, 1]} : vector<8x96xf32> to vector<8x8xf32>
    %20 = arith.truncf %19 : vector<8x8xf32> to vector<8x8xbf16>
    %21 = vector.extract_strided_slice %13 {offsets = [0, 64], sizes = [8, 8], strides = [1, 1]} : vector<8x96xf32> to vector<8x8xf32>
    %22 = arith.truncf %21 : vector<8x8xf32> to vector<8x8xbf16>
    %cst_16 = arith.constant dense<0.000000e+00> : vector<8x8xf32>
    %23 = tpu.matmul %18, %20, %cst_16 {dimension_numbers = #tpu.dot_dimension_numbers<[1], [1], [0], [0], [0, 0, 1, 0], [], []>} : vector<8x8xbf16>, vector<8x8xbf16>, vector<8x8xf32> -> vector<8x8xf32>
    %cst_17 = arith.constant 0.353553385 : f32
    %24 = vector.broadcast %cst_17 : f32 to vector<8x8xf32>
    %25 = arith.mulf %23, %24 : vector<8x8xf32>
    %26 = arith.addf %25, %15 : vector<8x8xf32>
    %cst_18 = arith.constant dense<0xFF800000> : vector<8xf32>
    %27 = vector.multi_reduction <maximumf>, %26, %cst_18 [1] : vector<8x8xf32> to vector<8xf32>
    %28 = vector.shape_cast %27 : vector<8xf32> to vector<8x1xf32>
    %29 = vector.broadcast %28 : vector<8x1xf32> to vector<8x8xf32>
    %30 = arith.subf %26, %29 : vector<8x8xf32>
    %31 = math.exp %30 : vector<8x8xf32>
    %cst_19 = arith.constant dense<0.000000e+00> : vector<8xf32>
    %32 = vector.multi_reduction <add>, %31, %cst_19 [1] : vector<8x8xf32> to vector<8xf32>
    %33 = vector.shape_cast %32 : vector<8xf32> to vector<8x1xf32>
    %34 = tpu.reciprocal %33 {approx = true} : vector<8x1xf32> -> vector<8x1xf32>
    %35 = vector.broadcast %34 : vector<8x1xf32> to vector<8x8xf32>
    %36 = arith.mulf %31, %35 : vector<8x8xf32>
    %37 = arith.truncf %36 : vector<8x8xf32> to vector<8x8xbf16>
    %cst_20 = arith.constant dense<0.000000e+00> : vector<8x8xf32>
    %38 = tpu.matmul %37, %22, %cst_20 {dimension_numbers = #tpu.dot_dimension_numbers<[1], [0], [0], [1], [0, 0, 1, 1], [], []>} : vector<8x8xbf16>, vector<8x8xbf16>, vector<8x8xf32> -> vector<8x8xf32>
    %39 = arith.truncf %38 : vector<8x8xf32> to vector<8x8xbf16>
    %c0_21 = arith.constant 0 : index
    %c0_22 = arith.constant 0 : index
    %c0_23 = arith.constant 0 : index
    %40 = vector.load %arg4[%c0_21, %c0_22, %c0_23] : memref<4x8x32xbf16, #tpu.memory_space<vmem>>, vector<1x8x32xbf16>
    %41 = vector.shape_cast %40 : vector<1x8x32xbf16> to vector<8x32xbf16>
    %cst_24 = arith.constant dense<0.000000e+00> : vector<8x32xf32>
    %42 = tpu.matmul %39, %41, %cst_24 {dimension_numbers = #tpu.dot_dimension_numbers<[1], [0], [0], [1], [0, 0, 1, 1], [], []>} : vector<8x8xbf16>, vector<8x32xbf16>, vector<8x32xf32> -> vector<8x32xf32>
    %43 = arith.addf %16, %42 : vector<8x32xf32>
    %44 = vector.extract_strided_slice %13 {offsets = [0, 8], sizes = [8, 8], strides = [1, 1]} : vector<8x96xf32> to vector<8x8xf32>
    %45 = arith.truncf %44 : vector<8x8xf32> to vector<8x8xbf16>
    %46 = vector.extract_strided_slice %13 {offsets = [0, 40], sizes = [8, 8], strides = [1, 1]} : vector<8x96xf32> to vector<8x8xf32>
    %47 = arith.truncf %46 : vector<8x8xf32> to vector<8x8xbf16>
    %48 = vector.extract_strided_slice %13 {offsets = [0, 72], sizes = [8, 8], strides = [1, 1]} : vector<8x96xf32> to vector<8x8xf32>
    %49 = arith.truncf %48 : vector<8x8xf32> to vector<8x8xbf16>
    %cst_25 = arith.constant dense<0.000000e+00> : vector<8x8xf32>
    %50 = tpu.matmul %45, %47, %cst_25 {dimension_numbers = #tpu.dot_dimension_numbers<[1], [1], [0], [0], [0, 0, 1, 0], [], []>} : vector<8x8xbf16>, vector<8x8xbf16>, vector<8x8xf32> -> vector<8x8xf32>
    %cst_26 = arith.constant 0.353553385 : f32
    %51 = vector.broadcast %cst_26 : f32 to vector<8x8xf32>
    %52 = arith.mulf %50, %51 : vector<8x8xf32>
    %53 = arith.addf %52, %15 : vector<8x8xf32>
    %cst_27 = arith.constant dense<0xFF800000> : vector<8xf32>
    %54 = vector.multi_reduction <maximumf>, %53, %cst_27 [1] : vector<8x8xf32> to vector<8xf32>
    %55 = vector.shape_cast %54 : vector<8xf32> to vector<8x1xf32>
    %56 = vector.broadcast %55 : vector<8x1xf32> to vector<8x8xf32>
    %57 = arith.subf %53, %56 : vector<8x8xf32>
    %58 = math.exp %57 : vector<8x8xf32>
    %cst_28 = arith.constant dense<0.000000e+00> : vector<8xf32>
    %59 = vector.multi_reduction <add>, %58, %cst_28 [1] : vector<8x8xf32> to vector<8xf32>
    %60 = vector.shape_cast %59 : vector<8xf32> to vector<8x1xf32>
    %61 = tpu.reciprocal %60 {approx = true} : vector<8x1xf32> -> vector<8x1xf32>
    %62 = vector.broadcast %61 : vector<8x1xf32> to vector<8x8xf32>
    %63 = arith.mulf %58, %62 : vector<8x8xf32>
    %64 = arith.truncf %63 : vector<8x8xf32> to vector<8x8xbf16>
    %cst_29 = arith.constant dense<0.000000e+00> : vector<8x8xf32>
    %65 = tpu.matmul %64, %49, %cst_29 {dimension_numbers = #tpu.dot_dimension_numbers<[1], [0], [0], [1], [0, 0, 1, 1], [], []>} : vector<8x8xbf16>, vector<8x8xbf16>, vector<8x8xf32> -> vector<8x8xf32>
    %66 = arith.truncf %65 : vector<8x8xf32> to vector<8x8xbf16>
    %c1_30 = arith.constant 1 : index
    %c0_31 = arith.constant 0 : index
    %c0_32 = arith.constant 0 : index
    %67 = vector.load %arg4[%c1_30, %c0_31, %c0_32] : memref<4x8x32xbf16, #tpu.memory_space<vmem>>, vector<1x8x32xbf16>
    %68 = vector.shape_cast %67 : vector<1x8x32xbf16> to vector<8x32xbf16>
    %cst_33 = arith.constant dense<0.000000e+00> : vector<8x32xf32>
    %69 = tpu.matmul %66, %68, %cst_33 {dimension_numbers = #tpu.dot_dimension_numbers<[1], [0], [0], [1], [0, 0, 1, 1], [], []>} : vector<8x8xbf16>, vector<8x32xbf16>, vector<8x32xf32> -> vector<8x32xf32>
    %70 = arith.addf %43, %69 : vector<8x32xf32>
    %71 = vector.extract_strided_slice %13 {offsets = [0, 16], sizes = [8, 8], strides = [1, 1]} : vector<8x96xf32> to vector<8x8xf32>
    %72 = arith.truncf %71 : vector<8x8xf32> to vector<8x8xbf16>
    %73 = vector.extract_strided_slice %13 {offsets = [0, 48], sizes = [8, 8], strides = [1, 1]} : vector<8x96xf32> to vector<8x8xf32>
    %74 = arith.truncf %73 : vector<8x8xf32> to vector<8x8xbf16>
    %75 = vector.extract_strided_slice %13 {offsets = [0, 80], sizes = [8, 8], strides = [1, 1]} : vector<8x96xf32> to vector<8x8xf32>
    %76 = arith.truncf %75 : vector<8x8xf32> to vector<8x8xbf16>
    %cst_34 = arith.constant dense<0.000000e+00> : vector<8x8xf32>
    %77 = tpu.matmul %72, %74, %cst_34 {dimension_numbers = #tpu.dot_dimension_numbers<[1], [1], [0], [0], [0, 0, 1, 0], [], []>} : vector<8x8xbf16>, vector<8x8xbf16>, vector<8x8xf32> -> vector<8x8xf32>
    %cst_35 = arith.constant 0.353553385 : f32
    %78 = vector.broadcast %cst_35 : f32 to vector<8x8xf32>
    %79 = arith.mulf %77, %78 : vector<8x8xf32>
    %80 = arith.addf %79, %15 : vector<8x8xf32>
    %cst_36 = arith.constant dense<0xFF800000> : vector<8xf32>
    %81 = vector.multi_reduction <maximumf>, %80, %cst_36 [1] : vector<8x8xf32> to vector<8xf32>
    %82 = vector.shape_cast %81 : vector<8xf32> to vector<8x1xf32>
    %83 = vector.broadcast %82 : vector<8x1xf32> to vector<8x8xf32>
    %84 = arith.subf %80, %83 : vector<8x8xf32>
    %85 = math.exp %84 : vector<8x8xf32>
    %cst_37 = arith.constant dense<0.000000e+00> : vector<8xf32>
    %86 = vector.multi_reduction <add>, %85, %cst_37 [1] : vector<8x8xf32> to vector<8xf32>
    %87 = vector.shape_cast %86 : vector<8xf32> to vector<8x1xf32>
    %88 = tpu.reciprocal %87 {approx = true} : vector<8x1xf32> -> vector<8x1xf32>
    %89 = vector.broadcast %88 : vector<8x1xf32> to vector<8x8xf32>
    %90 = arith.mulf %85, %89 : vector<8x8xf32>
    %91 = arith.truncf %90 : vector<8x8xf32> to vector<8x8xbf16>
    %cst_38 = arith.constant dense<0.000000e+00> : vector<8x8xf32>
    %92 = tpu.matmul %91, %76, %cst_38 {dimension_numbers = #tpu.dot_dimension_numbers<[1], [0], [0], [1], [0, 0, 1, 1], [], []>} : vector<8x8xbf16>, vector<8x8xbf16>, vector<8x8xf32> -> vector<8x8xf32>
    %93 = arith.truncf %92 : vector<8x8xf32> to vector<8x8xbf16>
    %c2_39 = arith.constant 2 : index
    %c0_40 = arith.constant 0 : index
    %c0_41 = arith.constant 0 : index
    %94 = vector.load %arg4[%c2_39, %c0_40, %c0_41] : memref<4x8x32xbf16, #tpu.memory_space<vmem>>, vector<1x8x32xbf16>
    %95 = vector.shape_cast %94 : vector<1x8x32xbf16> to vector<8x32xbf16>
    %cst_42 = arith.constant dense<0.000000e+00> : vector<8x32xf32>
    %96 = tpu.matmul %93, %95, %cst_42 {dimension_numbers = #tpu.dot_dimension_numbers<[1], [0], [0], [1], [0, 0, 1, 1], [], []>} : vector<8x8xbf16>, vector<8x32xbf16>, vector<8x32xf32> -> vector<8x32xf32>
    %97 = arith.addf %70, %96 : vector<8x32xf32>
    %98 = vector.extract_strided_slice %13 {offsets = [0, 24], sizes = [8, 8], strides = [1, 1]} : vector<8x96xf32> to vector<8x8xf32>
    %99 = arith.truncf %98 : vector<8x8xf32> to vector<8x8xbf16>
    %100 = vector.extract_strided_slice %13 {offsets = [0, 56], sizes = [8, 8], strides = [1, 1]} : vector<8x96xf32> to vector<8x8xf32>
    %101 = arith.truncf %100 : vector<8x8xf32> to vector<8x8xbf16>
    %102 = vector.extract_strided_slice %13 {offsets = [0, 88], sizes = [8, 8], strides = [1, 1]} : vector<8x96xf32> to vector<8x8xf32>
    %103 = arith.truncf %102 : vector<8x8xf32> to vector<8x8xbf16>
    %cst_43 = arith.constant dense<0.000000e+00> : vector<8x8xf32>
    %104 = tpu.matmul %99, %101, %cst_43 {dimension_numbers = #tpu.dot_dimension_numbers<[1], [1], [0], [0], [0, 0, 1, 0], [], []>} : vector<8x8xbf16>, vector<8x8xbf16>, vector<8x8xf32> -> vector<8x8xf32>
    %cst_44 = arith.constant 0.353553385 : f32
    %105 = vector.broadcast %cst_44 : f32 to vector<8x8xf32>
    %106 = arith.mulf %104, %105 : vector<8x8xf32>
    %107 = arith.addf %106, %15 : vector<8x8xf32>
    %cst_45 = arith.constant dense<0xFF800000> : vector<8xf32>
    %108 = vector.multi_reduction <maximumf>, %107, %cst_45 [1] : vector<8x8xf32> to vector<8xf32>
    %109 = vector.shape_cast %108 : vector<8xf32> to vector<8x1xf32>
    %110 = vector.broadcast %109 : vector<8x1xf32> to vector<8x8xf32>
    %111 = arith.subf %107, %110 : vector<8x8xf32>
    %112 = math.exp %111 : vector<8x8xf32>
    %cst_46 = arith.constant dense<0.000000e+00> : vector<8xf32>
    %113 = vector.multi_reduction <add>, %112, %cst_46 [1] : vector<8x8xf32> to vector<8xf32>
    %114 = vector.shape_cast %113 : vector<8xf32> to vector<8x1xf32>
    %115 = tpu.reciprocal %114 {approx = true} : vector<8x1xf32> -> vector<8x1xf32>
    %116 = vector.broadcast %115 : vector<8x1xf32> to vector<8x8xf32>
    %117 = arith.mulf %112, %116 : vector<8x8xf32>
    %118 = arith.truncf %117 : vector<8x8xf32> to vector<8x8xbf16>
    %cst_47 = arith.constant dense<0.000000e+00> : vector<8x8xf32>
    %119 = tpu.matmul %118, %103, %cst_47 {dimension_numbers = #tpu.dot_dimension_numbers<[1], [0], [0], [1], [0, 0, 1, 1], [], []>} : vector<8x8xbf16>, vector<8x8xbf16>, vector<8x8xf32> -> vector<8x8xf32>
    %120 = arith.truncf %119 : vector<8x8xf32> to vector<8x8xbf16>
    %c3_48 = arith.constant 3 : index
    %c0_49 = arith.constant 0 : index
    %c0_50 = arith.constant 0 : index
    %121 = vector.load %arg4[%c3_48, %c0_49, %c0_50] : memref<4x8x32xbf16, #tpu.memory_space<vmem>>, vector<1x8x32xbf16>
    %122 = vector.shape_cast %121 : vector<1x8x32xbf16> to vector<8x32xbf16>
    %cst_51 = arith.constant dense<0.000000e+00> : vector<8x32xf32>
    %123 = tpu.matmul %120, %122, %cst_51 {dimension_numbers = #tpu.dot_dimension_numbers<[1], [0], [0], [1], [0, 0, 1, 1], [], []>} : vector<8x8xbf16>, vector<8x32xbf16>, vector<8x32xf32> -> vector<8x32xf32>
    %124 = arith.addf %97, %123 : vector<8x32xf32>
    %125 = vector.broadcast %2 : vector<1x32xf32> to vector<8x32xf32>
    %126 = arith.addf %124, %125 : vector<8x32xf32>
    %127 = arith.addf %0, %126 : vector<8x32xf32>
    %cst_52 = arith.constant dense<0.000000e+00> : vector<8xf32>
    %128 = vector.multi_reduction <add>, %127, %cst_52 [1] : vector<8x32xf32> to vector<8xf32>
    %129 = vector.shape_cast %128 : vector<8xf32> to vector<8x1xf32>
    %cst_53 = arith.constant 3.200000e+01 : f32
    %130 = vector.broadcast %cst_53 : f32 to vector<8x1xf32>
    %131 = arith.divf %129, %130 : vector<8x1xf32>
    %132 = vector.broadcast %131 : vector<8x1xf32> to vector<8x32xf32>
    %133 = arith.subf %127, %132 : vector<8x32xf32>
    %134 = arith.mulf %133, %133 : vector<8x32xf32>
    %cst_54 = arith.constant dense<0.000000e+00> : vector<8xf32>
    %135 = vector.multi_reduction <add>, %134, %cst_54 [1] : vector<8x32xf32> to vector<8xf32>
    %136 = vector.shape_cast %135 : vector<8xf32> to vector<8x1xf32>
    %cst_55 = arith.constant 0.0322580636 : f32
    %137 = vector.broadcast %cst_55 : f32 to vector<8x1xf32>
    %138 = arith.mulf %136, %137 : vector<8x1xf32>
    %139 = vector.broadcast %131 : vector<8x1xf32> to vector<8x32xf32>
    %140 = arith.subf %127, %139 : vector<8x32xf32>
    %141 = vector.broadcast %3 : vector<1x32xf32> to vector<8x32xf32>
    %142 = arith.mulf %141, %140 : vector<8x32xf32>
    %143 = math.sqrt %138 : vector<8x1xf32>
    %cst_56 = arith.constant 9.99999997E-7 : f32
    %144 = vector.broadcast %cst_56 : f32 to vector<8x1xf32>
    %145 = arith.addf %143, %144 : vector<8x1xf32>
    %146 = vector.broadcast %145 : vector<8x1xf32> to vector<8x32xf32>
    %147 = arith.divf %142, %146 : vector<8x32xf32>
    %148 = vector.broadcast %4 : vector<1x32xf32> to vector<8x32xf32>
    %149 = arith.addf %147, %148 : vector<8x32xf32>
    %150 = arith.truncf %149 : vector<8x32xf32> to vector<8x32xbf16>
    %c0_57 = arith.constant 0 : index
    %c0_58 = arith.constant 0 : index
    %151 = vector.load %arg5[%c0_57, %c0_58] : memref<32x64xbf16, #tpu.memory_space<vmem>>, vector<32x64xbf16>
    %cst_59 = arith.constant dense<0.000000e+00> : vector<8x64xf32>
    %152 = tpu.matmul %150, %151, %cst_59 {dimension_numbers = #tpu.dot_dimension_numbers<[1], [0], [0], [1], [0, 0, 1, 1], [], []>} : vector<8x32xbf16>, vector<32x64xbf16>, vector<8x64xf32> -> vector<8x64xf32>
    %153 = vector.broadcast %5 : vector<1x64xf32> to vector<8x64xf32>
    %154 = arith.addf %152, %153 : vector<8x64xf32>
    %cst_60 = arith.constant 0.000000e+00 : f32
    %155 = vector.broadcast %cst_60 : f32 to vector<8x64xf32>
    %156 = arith.maximumf %154, %155 : vector<8x64xf32>
    %157 = arith.truncf %156 : vector<8x64xf32> to vector<8x64xbf16>
    %c0_61 = arith.constant 0 : index
    %c0_62 = arith.constant 0 : index
    %158 = vector.load %arg6[%c0_61, %c0_62] : memref<64x32xbf16, #tpu.memory_space<vmem>>, vector<64x32xbf16>
    %cst_63 = arith.constant dense<0.000000e+00> : vector<8x32xf32>
    %159 = tpu.matmul %157, %158, %cst_63 {dimension_numbers = #tpu.dot_dimension_numbers<[1], [0], [0], [1], [0, 0, 1, 1], [], []>} : vector<8x64xbf16>, vector<64x32xbf16>, vector<8x32xf32> -> vector<8x32xf32>
    %160 = vector.broadcast %6 : vector<1x32xf32> to vector<8x32xf32>
    %161 = arith.addf %159, %160 : vector<8x32xf32>
    %162 = arith.addf %149, %161 : vector<8x32xf32>
    %cst_64 = arith.constant dense<0.000000e+00> : vector<8xf32>
    %163 = vector.multi_reduction <add>, %162, %cst_64 [1] : vector<8x32xf32> to vector<8xf32>
    %164 = vector.shape_cast %163 : vector<8xf32> to vector<8x1xf32>
    %cst_65 = arith.constant 3.200000e+01 : f32
    %165 = vector.broadcast %cst_65 : f32 to vector<8x1xf32>
    %166 = arith.divf %164, %165 : vector<8x1xf32>
    %167 = vector.broadcast %166 : vector<8x1xf32> to vector<8x32xf32>
    %168 = arith.subf %162, %167 : vector<8x32xf32>
    %169 = arith.mulf %168, %168 : vector<8x32xf32>
    %cst_66 = arith.constant dense<0.000000e+00> : vector<8xf32>
    %170 = vector.multi_reduction <add>, %169, %cst_66 [1] : vector<8x32xf32> to vector<8xf32>
    %171 = vector.shape_cast %170 : vector<8xf32> to vector<8x1xf32>
    %cst_67 = arith.constant 0.0322580636 : f32
    %172 = vector.broadcast %cst_67 : f32 to vector<8x1xf32>
    %173 = arith.mulf %171, %172 : vector<8x1xf32>
    %174 = vector.broadcast %166 : vector<8x1xf32> to vector<8x32xf32>
    %175 = arith.subf %162, %174 : vector<8x32xf32>
    %176 = vector.broadcast %7 : vector<1x32xf32> to vector<8x32xf32>
    %177 = arith.mulf %176, %175 : vector<8x32xf32>
    %178 = math.sqrt %173 : vector<8x1xf32>
    %cst_68 = arith.constant 9.99999997E-7 : f32
    %179 = vector.broadcast %cst_68 : f32 to vector<8x1xf32>
    %180 = arith.addf %178, %179 : vector<8x1xf32>
    %181 = vector.broadcast %180 : vector<8x1xf32> to vector<8x32xf32>
    %182 = arith.divf %177, %181 : vector<8x32xf32>
    %183 = vector.broadcast %8 : vector<1x32xf32> to vector<8x32xf32>
    %184 = arith.addf %182, %183 : vector<8x32xf32>
    %c0_69 = arith.constant 0 : index
    %c0_70 = arith.constant 0 : index
    %185 = vector.load %arg8[%c0_69, %c0_70] : memref<8x32xf32, #tpu.memory_space<vmem>>, vector<8x32xf32>
    tpu.vector_store %arg8[%c0_69, %c0_70], %184 {strides = array<i32>} : memref<8x32xf32, #tpu.memory_space<vmem>>, vector<8x32xf32>,
    return
  }
  func.func @transform_0(%arg0: i32) -> (i32, i32) {
    %c0_i32 = arith.constant 0 : i32
    %c0_i32_0 = arith.constant 0 : i32
    return %arg0, %c0_i32 : i32, i32
  }
  func.func @transform_1(%arg0: i32) -> (i32, i32, i32) {
    %c0_i32 = arith.constant 0 : i32
    %c0_i32_0 = arith.constant 0 : i32
    %c0_i32_1 = arith.constant 0 : i32
    return %arg0, %c0_i32, %c0_i32_0 : i32, i32, i32
  }
  func.func @transform_2(%arg0: i32) -> (i32, i32) {
    %c0_i32 = arith.constant 0 : i32
    %c0_i32_0 = arith.constant 0 : i32
    %c0_i32_1 = arith.constant 0 : i32
    return %c0_i32, %c0_i32_0 : i32, i32
  }
  func.func @transform_3(%arg0: i32) -> (i32, i32, i32) {
    %c0_i32 = arith.constant 0 : i32
    %c0_i32_0 = arith.constant 0 : i32
    %c0_i32_1 = arith.constant 0 : i32
    %c0_i32_2 = arith.constant 0 : i32
    return %c0_i32, %c0_i32_0, %c0_i32_1 : i32, i32, i32
  }
  func.func @transform_4(%arg0: i32) -> (i32, i32) {
    %c0_i32 = arith.constant 0 : i32
    %c0_i32_0 = arith.constant 0 : i32
    %c0_i32_1 = arith.constant 0 : i32
    return %c0_i32, %c0_i32_0 : i32, i32
  }
  func.func @transform_5(%arg0: i32) -> (i32, i32) {
    %c0_i32 = arith.constant 0 : i32
    %c0_i32_0 = arith.constant 0 : i32
    %c0_i32_1 = arith.constant 0 : i32
    return %c0_i32, %c0_i32_0 : i32, i32
  }
  func.func @transform_6(%arg0: i32) -> (i32, i32) {
    %c0_i32 = arith.constant 0 : i32
    %c0_i32_0 = arith.constant 0 : i32
    %c0_i32_1 = arith.constant 0 : i32
    return %c0_i32, %c0_i32_0 : i32, i32
  }
  func.func @transform_7(%arg0: i32) -> (i32, i32) {
    %c0_i32 = arith.constant 0 : i32
    %c0_i32_0 = arith.constant 0 : i32
    return %arg0, %c0_i32 : i32, i32
  }
}

</mosaic_0001>

<bundles_post_ra>
// kernel: encoder_layer.1
= control target key start
LH: loop header
LB: loop body
LE: loop exit
PB: predicated region body
PF: predicated region fallthrough
CT: control target
= control target key end

     0   :  { %12 = vsyncpa [#allocation3], 0  ;;  %s1983_s0 = inlined_call_operand.vmem [shape: f32[16,32], index: 0, kind: input, shape index: {}]   ;;  %s1984_s1 = inlined_call_operand.vmem [shape: f32[2,8,8], index: 1, kind: input, shape index: {}]   ;;  %s1985_s2 = inlined_call_operand.vmem [shape: bf16[32,96], index: 2, kind: input, shape index: {}]   ;;  %s1986_s3 = inlined_call_operand.vmem [shape: bf16[4,8,32], index: 3, kind: input, shape index: {}]   ;;  %s1987_s4 = inlined_call_operand.vmem [shape: bf16[32,64], index: 4, kind: input, shape index: {}]   ;;  %s1988_s5 = inlined_call_operand.vmem [shape: bf16[64,32], index: 5, kind: input, shape index: {}]   ;;  %s1989_s6 = inlined_call_operand.vmem [shape: f32[8,128], index: 6, kind: input, shape index: {}]   ;;  %s1990_s7 = inlined_call_operand.hbm [shape: f32[16,32], index: 7, kind: output, shape index: {}]  }
   0x1   :  { %14 = vsyncpa [#allocation3 + $0x1], 0  ;;  %s1696_s24 = smov 0   ;;  %s1698_s25 = smov 0  }
   0x2   :  { %s1700_s26 = smov 0   ;;  %s1702_s27 = smov 0  }
   0x3 LB: > { %s1717_s28 = sadd.s32 4294967295, %s1640_s27   ;;  %s1314_s29 = sadd.s32 4294967294, %s1640_s27   ;;  %s1640_s27 = sphi %s1702_s27, %s1996_s27   ;;  %s1636_s26 = sphi %s1700_s26, %s1995_s26   ;;  %s1632_s25 = sphi %s1698_s25, %s1994_s25   ;;  %s1628_s24 = sphi %s1696_s24, %s1993_s24  }
   0x4   : > { %s1721_s30 = sadd.s32 1, %s1640_s27   ;;  %s184_s8 = sadd.s32 1, %s1636_s26 }
   0x5   : > { %s181_s9 = ssub.s32 %s1640_s27, %s1721_s30  ;;  %p194_p0 = scmp.ne.s32.totalorder %s1636_s26, %s1632_s25 }
   0x6   : > { %p182_p1 = scmp.eq.s32.totalorder %s181_s9, 0  ;;  %p195_p2 = scmp.eq.s32.totalorder %s1717_s28, 1 }
   0x7   : > { %p200_p3 = scmp.ne.s32.totalorder %s1632_s25, %s1628_s24  ;;  %p201_p4 = scmp.eq.s32.totalorder %s1314_s29, 1 }
   0x8   : > { %s1732_s10 = scalar_select %p182_p1, %s1636_s26, %s184_s8  }
   0x9   : > { %p1734_p5 = por %p195_p2, %p194_p0  ;;  %p1738_p6 = por %p201_p4, %p200_p3 }
   0xa   : > { %p1317_p7 = scmp.ge.s32.totalorder %s1640_s27, 1  ;;  %p248_p8 = scmp.lt.s32.totalorder %s1640_s27, 3 }
   0xc   : > { %p249_p9 = pnand %p1317_p7, %p248_p8 }
   0xd   : > { %v1546_v0 = vld [vmem:[%s1985_s2] sm:$0xff] (!%p249_p9)   ;;  %v1642_v1 = vmov (!%p249_p9), 0.0   ;;  %v1547_v2 = vld [vmem:[%s1985_s2 + $0x8] sm:$0xff] (!%p249_p9)   ;;  %vm1643_vm0 = vmmov (!%p249_p9), 0   ;;  %p283_p10 = scmp.lt.s32.totalorder (!%p249_p9), %s1717_s28, 1  ;;  %vm322_vm1 = vcmask (!%p249_p9), 261120  }
   0xe   : > { %252 = sbr.rel (%p249_p9) target bundleno = 3735 (0xe97), region = 48  ;;  %1394 = vmatprep.subr.bf16.mxu1 (!%p249_p9), %v1642_v1  ;;  %1408 = vmatprep.subr.bf16.mxu0 (!%p249_p9), %v1642_v1  ;;  %v1321_v5 = vld [vmem:[%s1989_s6] ss:$0 sm:$0xff] (!%p249_p9)  ;;  %s1644_s29 = smov (!%p249_p9), 120   ;;  %vm371_vm2 = vcmask (!%p249_p9), 64512   ;;  %vm437_vm3 = vcmask (!%p249_p9), 1043456  }
   0xf   : > { %1395 = vmatpush3.bf16.msra.mxu1 (!%p249_p9), %v1546_v0  ;;  %1398 = vmatprep.mubr.msk.bf16.mxu1 (!%p249_p9), %vm1643_vm0, %v1642_v1  ;;  %s1645_s8 = smov (!%p249_p9), 96   ;;  %s1646_s9 = smov (!%p249_p9), 88   ;;  %v482_v54 = vld [vmem:[%s1986_s3] sm:$0xf] (!%p249_p9)  ;;  %v1329_v56 = vld [vmem:[%s1986_s3 + $0x4] sm:$0xf] (!%p249_p9) }
  0x10   : > { %1396 = vmatprep.subr.bf16.mxu1 (!%p249_p9), %v1642_v1  ;;  %1410 = vmatprep.mubr.msk.bf16.mxu0 (!%p249_p9), %vm1643_vm0, %v1642_v1  ;;  %s1647_s16 = smov (!%p249_p9), 64   ;;  %s1650_s19 = smov (!%p249_p9), 80   ;;  %v648_v55 = vsel (!%p249_p9), %vm437_vm3, %v482_v54, 0  ;;  %v602_v57 = vsel (!%p249_p9), %vm437_vm3, %v1329_v56, 0  ;;  %vm1153_vm6 = vcmask (!%p249_p9), 523264  }
  0x13   : > { %1397 = vmatpush3.bf16.msra.mxu1 (!%p249_p9), %v1547_v2 }
  0x14   : > { %1402 = vmatprep.subr.bf16.mxu1 (!%p249_p9), %v1642_v1 }
  0x15   : > { %s1759_s17 = scalar_select %p283_p10, %s1717_s28, 1 }
  0x17   : > { %s1319_s18 = sshll.u32 %s1759_s17, 3  ;;  %s1648_s17 = smov 56  }
  0x18   : > { %s286_s21 = scalar_lea.vmem %s1983_s0, %s1319_s18  ;;  %s290_s15 = scalar_lea.vmem %s1984_s1, %s1319_s18 }
  0x19   : > { %v1768_v3 = vld [vmem:[%s286_s21] sm:$0xff]  ;;  %s1649_s18 = smov 112  }
  0x1a   : > { %v301_v4 = vpack.c.bf16 %v1768_v3, %v1768_v3  ;;  %v1799_v18 = vld [vmem:[%s290_s15] sm:$0xff]  ;;  %s1654_s15 = smov 40  }
  0x1c   : > { %1399 = vmatmul.mubr.msk.bf16.vlgmr.msra.gmra.mrb[0].mxu1 %vm322_vm1, %v301_v4 }
  0x1d   : > { %1404 = vmatprep.mubr.msk.bf16.mxu1 %vm1643_vm0, %v1642_v1 }
  0xef   : > { %v360_v6 = vpop.f32.mrb[0].mxu1 }
  0xf0   : > { %v361_v7 = vadd.f32 %v1321_v5, %v360_v6  ;;  %v1400_v8 = vpop.f32.mrb[1].mxu1 }
  0xf1   : > { %v363_v9 = vpop.f32.mrb[2].mxu1 }
  0xf2   : > { %v1778_v10 = vpack.c.bf16 %v361_v7, %v361_v7  ;;  %v1401_v11 = vpop.f32.mrb[3].mxu1 }
  0xf4   : > { %483 = vrot.lane.b32.xlu1 %v1778_v10, %s1644_s29  ;;  %369 = vrot.lane.b32.xlu0 %v1778_v10, %s1645_s8  ;;  %s1651_s29 = smov 72   ;;  %s1652_s8 = smov 104  }
  0xf8   : > { %485 = vrot.lane.b32.xlu0 %v1778_v10, %s1646_s9  ;;  %s1653_s9 = smov 48  }
 0x166   : > { %v370_v12 = vpop.permute.xlu0 %369  ;;  %v484_v16 = vpop.permute.xlu1 %483 }
 0x167   : > { %v376_v13 = vsel %vm371_vm2, %v370_v12, 0 }
 0x168   : > { %1403 = vmatpush3.bf16.xpose.msra.mxu1 %v376_v13 }
 0x169   : > { %1414 = vmatprep.subr.bf16.mxu1 %v1642_v1 }
 0x16a   : > { %v486_v14 = vpop.permute.xlu0 %485 }
 0x16b   : > { %v491_v15 = vsel %vm371_vm2, %v486_v14, 0 }
 0x16f   : > { %1405 = vmatmul.mubr.msk.bf16.vlgmr.msra.gmra.mrb[4].mxu1 %vm371_vm2, %v1778_v10 }
 0x170   : > { %1415 = vmatpush3.bf16.xpose.msra.mxu1 %v491_v15  ;;  %1416 = vmatprep.mubr.msk.bf16.mxu1 %vm1643_vm0, %v1642_v1 }
 0x171   : > { %1426 = vmatprep.subr.bf16.mxu1 %v1642_v1 }
 0x177   : > { %1417 = vmatmul.mubr.msk.bf16.vlgmr.msra.gmra.mrb[8].mxu1 %vm371_vm2, %v484_v16 }
 0x178   : > { %1428 = vmatprep.mubr.msk.bf16.mxu1 %vm1643_vm0, %v1642_v1  ;;  %1427 = vmatpush3.bf16.msra.mxu1 %v602_v57 }
 0x179   : > { %1438 = vmatprep.subr.bf16.mxu1 %v1642_v1 }
 0x242   : > { %v412_v17 = vpop.f32.mrb[4].mxu1 }
 0x243   : > { %v418_v19 = vmul.f32 0.35355338, %v412_v17  ;;  %v1406_v20 = vpop.f32.mrb[5].mxu1 }
 0x244   : > { %v415_v21 = vpop.f32.mrb[6].mxu1 }
 0x245   : > { %v1407_v22 = vpop.f32.mrb[7].mxu1  ;;  %v419_v23 = vadd.f32 %v418_v19, %v1799_v18 }
 0x247   : > { %v420_v24 = vsel %vm371_vm2, %v419_v23, -inf }
 0x248   : > { %421 = vmax.xlane.f32.xlu1 %v420_v24 }
 0x24a   : > { %v527_v25 = vpop.f32.mrb[8].mxu1 }
 0x24b   : > { %v533_v26 = vmul.f32 0.35355338, %v527_v25  ;;  %v1418_v27 = vpop.f32.mrb[9].mxu1 }
 0x24c   : > { %v530_v28 = vpop.f32.mrb[10].mxu1 }
 0x24d   : > { %v1419_v29 = vpop.f32.mrb[11].mxu1  ;;  %v534_v30 = vadd.f32 %v533_v26, %v1799_v18 }
 0x24f   : > { %v535_v31 = vsel %vm371_vm2, %v534_v30, -inf }
 0x250   : > { %536 = vmax.xlane.f32.xlu0 %v535_v31 }
 0x2d5   : > { %v422_v32 = vpop.xlane.xlu1 %421 }
 0x2d6   : > { %v423_v33 = vsub.f32 %v419_v23, %v422_v32 }
 0x2d8   : > { %v424_v34 = vmul.f32 1.442695, %v423_v33 }
 0x2da   : > { %1554 = vpow2.f32 %v424_v34 }
 0x2dd   : > { %v537_v35 = vpop.xlane.xlu0 %536 }
 0x2de   : > { %v538_v36 = vsub.f32 %v534_v30, %v537_v35 }
 0x2e0   : > { %v539_v37 = vmul.f32 1.442695, %v538_v36 }
 0x2e2   : > { %1556 = vpow2.f32 %v539_v37 }
 0x2e4   : > { %v1555_v38 = vpop.eup %1554 }
 0x2e5   : > { %v426_v39 = vsel %vm371_vm2, %v1555_v38, 0.0 }
 0x2e6   : > { %427 = vadd.xlane.f32.xlu0 %v426_v39 }
 0x2ec   : > { %v1557_v40 = vpop.eup %1556 }
 0x2ed   : > { %v541_v41 = vsel %vm371_vm2, %v1557_v40, 0.0 }
 0x2ee   : > { %542 = vadd.xlane.f32.xlu1 %v541_v41  ;;  %v1334_v41 = vld [vmem:[%s1986_s3 + $0x8] sm:$0xf] }
 0x2fc   : > { %432 = vrot.lane.b32.xlu0 %v1778_v10, %s1647_s16 }
 0x2ff   : > { %547 = vrot.lane.b32.xlu1 %v1778_v10, %s1648_s17 }
 0x300   : > { %690 = vrot.lane.b32.xlu0 %v1778_v10, %s1649_s18  ;;  %s1356_s18 = sshll.u32 %s1717_s28, 7  ;;  %s1655_s28 = smov [#allocation2]  }
 0x301   : > { %s1940_s23 = scalar_lea.hbm %s1990_s7, %s1356_s18 }
 0x303   : > { %692 = vrot.lane.b32.xlu1 %v1778_v10, %s1650_s19 }
 0x373   : > { %v428_v42 = vpop.xlane.xlu0 %427 }
 0x374   : > { %1558 = vrcp.f32 %v428_v42  ;;  %v809_v42 = vsel %vm437_vm3, %v1334_v41, 0  ;;  %v1341_v41 = vld [vmem:[%s1989_s6 + $0x2] ss:$0 sm:$0xff] }
 0x377   : > { %v433_v43 = vpop.permute.xlu0 %432 }
 0x378   : > { %v439_v44 = vsel %vm437_vm3, %v433_v43, 0 }
 0x379   : > { %1409 = vmatpush3.bf16.msra.mxu0 %v439_v44 }
 0x37a   : > { %1420 = vmatprep.subr.bf16.mxu0 %v1642_v1 }
 0x37b   : > { %v543_v45 = vpop.xlane.xlu1 %542  ;;  %v691_v8 = vpop.permute.xlu0 %690 }
 0x37c   : > { %1560 = vrcp.f32 %v543_v45 }
 0x37e   : > { %v1559_v46 = vpop.eup %1558 }
 0x37f   : > { %v430_v47 = vmul.f32 %v1559_v46, %v1555_v38  ;;  %v548_v48 = vpop.permute.xlu1 %547 }
 0x380   : > { %v553_v50 = vsel %vm437_vm3, %v548_v48, 0 }
 0x381   : > { %v431_v49 = vpack.c.bf16 %v430_v47, %v430_v47 }
 0x383   : > { %1411 = vmatmul.mubr.msk.bf16.vlgmr.msra.gmra.mrb[0].mxu0 %vm371_vm2, %v431_v49  ;;  %v693_v63 = vpop.permute.xlu1 %692 }
 0x384   : > { %1421 = vmatpush3.bf16.msra.mxu0 %v553_v50  ;;  %1422 = vmatprep.mubr.msk.bf16.mxu0 %vm1643_vm0, %v1642_v1  ;;  %v698_v6 = vsel %vm371_vm2, %v693_v63, 0 }
 0x385   : > { %1432 = vmatprep.subr.bf16.mxu0 %v1642_v1 }
 0x386   : > { %v1561_v51 = vpop.eup %1560 }
 0x387   : > { %v545_v52 = vmul.f32 %v1561_v51, %v1557_v40 }
 0x389   : > { %v546_v53 = vpack.c.bf16 %v545_v52, %v545_v52 }
 0x38b   : > { %1423 = vmatmul.mubr.msk.bf16.vlgmr.msra.gmra.mrb[4].mxu0 %vm371_vm2, %v546_v53 }
 0x38c   : > { %1434 = vmatprep.mubr.msk.bf16.mxu0 %vm1643_vm0, %v1642_v1  ;;  %1433 = vmatpush3.bf16.msra.mxu0 %v648_v55 }
 0x38d   : > { %1444 = vmatprep.subr.bf16.mxu0 %v1642_v1 }
 0x456   : > { %v475_v58 = vpop.f32.mrb[0].mxu0 }
 0x457   : > { %v481_v59 = vpack.c.bf16 %v475_v58, %v475_v58  ;;  %v1412_v60 = vpop.f32.mrb[1].mxu0 }
 0x458   : > { %v478_v61 = vpop.f32.mrb[2].mxu0 }
 0x459   : > { %v1413_v62 = vpop.f32.mrb[3].mxu0  ;;  %1435 = vmatmul.mubr.msk.bf16.vlgmr.msra.gmra.mrb[8].mxu0 %vm371_vm2, %v481_v59 }
 0x45a   : > { %1446 = vmatprep.mubr.msk.bf16.mxu0 %vm1643_vm0, %v1642_v1 }
 0x45e   : > { %v589_v0 = vpop.f32.mrb[4].mxu0 }
 0x45f   : > { %v595_v2 = vpack.c.bf16 %v589_v0, %v589_v0  ;;  %v1424_v4 = vpop.f32.mrb[5].mxu0 }
 0x460   : > { %v592_v5 = vpop.f32.mrb[6].mxu0 }
 0x461   : > { %v1425_v7 = vpop.f32.mrb[7].mxu0  ;;  %1429 = vmatmul.mubr.msk.bf16.vlgmr.msra.gmra.mrb[12].mxu1 %vm371_vm2, %v595_v2 }
 0x462   : > { %1439 = vmatpush3.bf16.xpose.msra.mxu1 %v698_v6  ;;  %1440 = vmatprep.mubr.msk.bf16.mxu1 %vm1643_vm0, %v1642_v1 }
 0x463   : > { %1450 = vmatprep.subr.bf16.mxu1 %v1642_v1 }
 0x469   : > { %1441 = vmatmul.mubr.msk.bf16.vlgmr.msra.gmra.mrb[16].mxu1 %vm371_vm2, %v691_v8 }
 0x46a   : > { %1452 = vmatprep.mubr.msk.bf16.mxu1 %vm1643_vm0, %v1642_v1  ;;  %1451 = vmatpush3.bf16.msra.mxu1 %v809_v42 }
 0x46b   : > { %1462 = vmatprep.subr.bf16.mxu1 %v1642_v1 }
 0x52c   : > { %v684_v9 = vpop.f32.mrb[8].mxu0 }
 0x52d   : > { %v1436_v11 = vpop.f32.mrb[9].mxu0 }
 0x52e   : > { %v687_v12 = vpop.f32.mrb[10].mxu0 }
 0x52f   : > { %v1437_v13 = vpop.f32.mrb[11].mxu0 }
 0x534   : > { %v638_v14 = vpop.f32.mrb[12].mxu1 }
 0x535   : > { %v1842_v15 = vadd.f32 %v684_v9, %v638_v14  ;;  %v1430_v16 = vpop.f32.mrb[13].mxu1 }
 0x536   : > { %v641_v17 = vpop.f32.mrb[14].mxu1 }
 0x537   : > { %v1431_v19 = vpop.f32.mrb[15].mxu1 }
 0x53c   : > { %v734_v20 = vpop.f32.mrb[16].mxu1 }
 0x53d   : > { %v740_v21 = vmul.f32 0.35355338, %v734_v20  ;;  %v1442_v22 = vpop.f32.mrb[17].mxu1 }
 0x53e   : > { %v737_v23 = vpop.f32.mrb[18].mxu1 }
 0x53f   : > { %v1443_v24 = vpop.f32.mrb[19].mxu1  ;;  %v741_v25 = vadd.f32 %v740_v21, %v1799_v18 }
 0x541   : > { %v742_v26 = vsel %vm371_vm2, %v741_v25, -inf }
 0x542   : > { %743 = vmax.xlane.f32.xlu1 %v742_v26 }
 0x553   : > { %854 = vrot.lane.b32.xlu1 %v1778_v10, %s1651_s29 }
 0x557   : > { %852 = vrot.lane.b32.xlu1 %v1778_v10, %s1652_s8 }
 0x5cf   : > { %v744_v27 = vpop.xlane.xlu1 %743 }
 0x5d0   : > { %v745_v28 = vsub.f32 %v741_v25, %v744_v27 }
 0x5d2   : > { %v746_v29 = vmul.f32 1.442695, %v745_v28 }
 0x5d3   : > { %v855_v37 = vpop.permute.xlu1 %854 }
 0x5d4   : > { %1562 = vpow2.f32 %v746_v29  ;;  %v860_v39 = vsel %vm371_vm2, %v855_v37, 0 }
 0x5d7   : > { %v853_v40 = vpop.permute.xlu1 %852 }
 0x5de   : > { %v1563_v30 = vpop.eup %1562 }
 0x5df   : > { %v748_v31 = vsel %vm371_vm2, %v1563_v30, 0.0 }
 0x5e0   : > { %749 = vadd.xlane.f32.xlu0 %v748_v31  ;;  %v1549_v31 = vld [vmem:[%s1987_s4 + $0x8] sm:$0xff]  }
 0x5f6   : > { %754 = vrot.lane.b32.xlu0 %v1778_v10, %s1653_s9  ;;  %s280_s9 = sand.u32 1, %s1632_s25  }
 0x5f7   : > { %s1318_s13 = sshll.u32 %s280_s9, 3  ;;  %s1230_s29 = scalar_lea.sflag [#allocation3], %s280_s9 }
 0x5f8   : > { %s282_s19 = scalar_lea.vmem [#allocation2], %s1318_s13  ;;  %s1582_s13 = sshll.u32 %s1655_s28, 4  ;;  %s1583_s13 = int_to_ptr.vmem [resolvable:$false] %s1582_s13 }
 0x5f9   : > { %s1243_s20 = sshll.u32 %s282_s19, 4  ;;  %s1584_s14 = scalar_lea.vmem %s1583_s13, 256  ;;  %s1942_s20 = int_to_ptr.vmem [resolvable:$true] %s1243_s20 }
 0x5fa   : > { %s1578_s8 = scalar_lea.vmem %s1942_s20, 128  ;;  %p1585_p0 = scmp.lt.s32.totalorder %s1942_s20, %s1583_s13 }
 0x5fb   : > { %p1579_p11 = scmp.ne.s32.totalorder %s1942_s20, %s1578_s8  ;;  %p1586_p1 = scmp.lt.s32.totalorder %s1584_s14, %s1578_s8 }
 0x5fd   : > { %p1580_p12 = pnand %p1579_p11, %p1734_p5  ;;  %p1587_p2 = por %p1586_p1, %p1585_p0 }
 0x5ff   : > { %p1581_p13 = pneg %p1580_p12 }
 0x601   : > { %p1588_p3 = pnand %p1587_p2, %p1581_p13 }
 0x66d   : > { %v750_v32 = vpop.xlane.xlu0 %749 }
 0x66e   : > { %1564 = vrcp.f32 %v750_v32  ;;  %v1551_v32 = vld [vmem:[%s1988_s5 + $0x8] sm:$0xff]  }
 0x671   : > { %v755_v33 = vpop.permute.xlu0 %754 }
 0x672   : > { %v760_v34 = vsel %vm437_vm3, %v755_v33, 0 }
 0x673   : > { %1445 = vmatpush3.bf16.msra.mxu0 %v760_v34 }
 0x674   : > { %1456 = vmatprep.subr.bf16.mxu0 %v1642_v1 }
 0x678   : > { %v1565_v35 = vpop.eup %1564 }
 0x679   : > { %v752_v36 = vmul.f32 %v1565_v35, %v1563_v30  ;;  %v1548_v30 = vld [vmem:[%s1987_s4] sm:$0xff]  }
 0x67b   : > { %v753_v38 = vpack.c.bf16 %v752_v36, %v752_v36 }
 0x67d   : > { %1447 = vmatmul.mubr.msk.bf16.vlgmr.msra.gmra.mrb[12].mxu0 %vm371_vm2, %v753_v38 }
 0x67e   : > { %1457 = vmatpush3.bf16.xpose.msra.mxu0 %v860_v39  ;;  %1458 = vmatprep.mubr.msk.bf16.mxu0 %vm1643_vm0, %v1642_v1 }
 0x67f   : > { %1468 = vmatprep.subr.bf16.mxu0 %v1642_v1 }
 0x685   : > { %1459 = vmatmul.mubr.msk.bf16.vlgmr.msra.gmra.mrb[16].mxu0 %vm371_vm2, %v853_v40 }
 0x686   : > { %1470 = vmatprep.mubr.msk.bf16.mxu0 %vm1643_vm0, %v1642_v1 }
 0x750   : > { %v796_v43 = vpop.f32.mrb[12].mxu0 }
 0x751   : > { %v802_v44 = vpack.c.bf16 %v796_v43, %v796_v43  ;;  %v1448_v45 = vpop.f32.mrb[13].mxu0 }
 0x752   : > { %v799_v46 = vpop.f32.mrb[14].mxu0 }
 0x753   : > { %v1449_v47 = vpop.f32.mrb[15].mxu0  ;;  %1453 = vmatmul.mubr.msk.bf16.vlgmr.msra.gmra.mrb[20].mxu1 %vm371_vm2, %v802_v44  ;;  %v1342_v44 = vld [vmem:[%s1989_s6 + $0x3] ss:$0 sm:$0xff] }
 0x754   : > { %1464 = vmatprep.mubr.msk.bf16.mxu1 %vm1643_vm0, %v1642_v1 }
 0x758   : > { %v896_v48 = vpop.f32.mrb[16].mxu0 }
 0x759   : > { %v902_v49 = vmul.f32 0.35355338, %v896_v48  ;;  %v1460_v50 = vpop.f32.mrb[17].mxu0  ;;  %v1552_v48 = vld [vmem:[%s1988_s5 + $0x10] sm:$0xff]  }
 0x75a   : > { %v899_v51 = vpop.f32.mrb[18].mxu0  ;;  %v1343_v50 = vld [vmem:[%s1989_s6 + $0x4] ss:$0 sm:$0xff] }
 0x75b   : > { %v1461_v52 = vpop.f32.mrb[19].mxu0  ;;  %v903_v53 = vadd.f32 %v902_v49, %v1799_v18  ;;  %v1338_v18 = vld [vmem:[%s1986_s3 + $0xc] sm:$0xf]  ;;  %v1553_v49 = vld [vmem:[%s1988_s5 + $0x18] sm:$0xff]  }
 0x75d   : > { %v904_v54 = vsel %vm371_vm2, %v903_v53, -inf }
 0x75e   : > { %905 = vmax.xlane.f32.xlu0 %v904_v54 }
 0x774   : > { %916 = vrot.lane.b32.xlu0 %v1778_v10, %s1654_s15  ;;  %v971_v10 = vsel %vm437_vm3, %v1338_v18, 0 }
 0x775   : > { %1469 = vmatpush3.bf16.msra.mxu0 %v971_v10 }
 0x776   : > { %1482 = vmatprep.subr.bf16.mxu0 %v1642_v1 }
 0x7eb   : > { %v906_v55 = vpop.xlane.xlu0 %905 }
 0x7ec   : > { %v907_v56 = vsub.f32 %v903_v53, %v906_v55 }
 0x7ee   : > { %v908_v57 = vmul.f32 1.442695, %v907_v56 }
 0x7ef   : > { %v917_v58 = vpop.permute.xlu0 %916 }
 0x7f0   : > { %1566 = vpow2.f32 %v908_v57  ;;  %v922_v59 = vsel %vm437_vm3, %v917_v58, 0 }
 0x7f1   : > { %1463 = vmatpush3.bf16.msra.mxu1 %v922_v59 }
 0x7f2   : > { %1474 = vmatprep.subr.bf16.mxu1 %v1642_v1 }
 0x7fa   : > { %v1567_v60 = vpop.eup %1566 }
 0x7fb   : > { %v910_v61 = vsel %vm371_vm2, %v1567_v60, 0.0 }
 0x7fc   : > { %911 = vadd.xlane.f32.xlu1 %v910_v61 }
 0x826   : > { %v845_v62 = vpop.f32.mrb[20].mxu1 }
 0x827   : > { %v851_v63 = vadd.f32 %v845_v62, %v1842_v15  ;;  %v1454_v0 = vpop.f32.mrb[21].mxu1  ;;  %v1340_v15 = vld [vmem:[%s1989_s6 + $0x1] ss:$0 sm:$0xff] }
 0x828   : > { %v848_v2 = vpop.f32.mrb[22].mxu1 }
 0x829   : > { %v1455_v4 = vpop.f32.mrb[23].mxu1 }
 0x889   : > { %v912_v5 = vpop.xlane.xlu1 %911 }
 0x88a   : > { %1568 = vrcp.f32 %v912_v5 }
 0x894   : > { %v1569_v6 = vpop.eup %1568 }
 0x895   : > { %v914_v7 = vmul.f32 %v1569_v6, %v1567_v60 }
 0x897   : > { %v915_v8 = vpack.c.bf16 %v914_v7, %v914_v7 }
 0x899   : > { %1465 = vmatmul.mubr.msk.bf16.vlgmr.msra.gmra.mrb[24].mxu1 %vm371_vm2, %v915_v8 }
 0x89a   : > { %1478 = vmatprep.mubr.msk.bf16.mxu1 %vm1643_vm0, %v1642_v1  ;;  %1475 = vmatpush3.bf16.msra.mxu1 %v1548_v30 }
 0x89b   : > { %1476 = vmatprep.subr.bf16.mxu1 %v1642_v1 }
 0x89e   : > { %1477 = vmatpush3.bf16.msra.mxu1 %v1549_v31 }
 0x96c   : > { %v958_v9 = vpop.f32.mrb[24].mxu1 }
 0x96d   : > { %v964_v11 = vpack.c.bf16 %v958_v9, %v958_v9  ;;  %v1466_v12 = vpop.f32.mrb[25].mxu1 }
 0x96e   : > { %v961_v13 = vpop.f32.mrb[26].mxu1 }
 0x96f   : > { %v1467_v14 = vpop.f32.mrb[27].mxu1  ;;  %1471 = vmatmul.mubr.msk.bf16.vlgmr.msra.gmra.mrb[20].mxu0 %vm371_vm2, %v964_v11 }
 0x970   : > { %1490 = vmatprep.mubr.msk.bf16.mxu0 %vm1643_vm0, %v1642_v1 }
 0xa42   : > { %v1007_v16 = vpop.f32.mrb[20].mxu0 }
 0xa43   : > { %v1013_v17 = vadd.f32 %v1007_v16, %v851_v63  ;;  %v1472_v19 = vpop.f32.mrb[21].mxu0 }
 0xa44   : > { %v1010_v20 = vpop.f32.mrb[22].mxu0  ;;  %v1354_v19 = vld [vmem:[%s1989_s6 + $0x7] ss:$0 sm:$0xff] }
 0xa45   : > { %v1018_v21 = vadd.f32 %v1340_v15, %v1013_v17  ;;  %v1473_v22 = vpop.f32.mrb[23].mxu0  ;;  %v1353_v15 = vld [vmem:[%s1989_s6 + $0x6] ss:$0 sm:$0xff] }
 0xa47   : > { %v1019_v23 = vadd.f32 %v1018_v21, %v1768_v3  ;;  %v1550_v3 = vld [vmem:[%s1988_s5] sm:$0xff]  }
 0xa48   : > { %1483 = vmatpush3.bf16.msra.mxu0 %v1550_v3 }
 0xa49   : > { %v1020_v24 = vsel %vm322_vm1, %v1019_v23, 0.0  ;;  %1484 = vmatprep.subr.bf16.mxu0 %v1642_v1 }
 0xa4a   : > { %1021 = vadd.xlane.f32.xlu1 %v1020_v24 }
 0xa4c   : > { %1485 = vmatpush3.bf16.msra.mxu0 %v1551_v32 }
 0xa4d   : > { %1486 = vmatprep.subr.bf16.mxu0 %v1642_v1 }
 0xa50   : > { %1487 = vmatpush3.bf16.msra.mxu0 %v1552_v48 }
 0xa51   : > { %1488 = vmatprep.subr.bf16.mxu0 %v1642_v1  ;;  %v1347_v1 = vld [vmem:[%s1989_s6 + $0x5] ss:$0 sm:$0xff] }
 0xa54   : > { %1489 = vmatpush3.bf16.msra.mxu0 %v1553_v49 }
 0xad7   : > { %v1022_v25 = vpop.xlane.xlu1 %1021 }
 0xad8   : > { %v1024_v26 = vmul.f32 0.03125, %v1022_v25 }
 0xada   : > { %v1025_v27 = vsub.f32 %v1019_v23, %v1024_v26 }
 0xadc   : > { %v1026_v28 = vmul.f32 %v1025_v27, %v1025_v27  ;;  %v1035_v42 = vmul.f32 %v1341_v41, %v1025_v27 }
 0xade   : > { %v1027_v29 = vsel %vm322_vm1, %v1026_v28, 0.0 }
 0xadf   : > { %1028 = vadd.xlane.f32.xlu1 %v1027_v29 }
 0xb6c   : > { %v1029_v33 = vpop.xlane.xlu1 %1028 }
 0xb6d   : > { %v1030_v34 = vmul.f32 0.032258064, %v1029_v33 }
 0xb6f   : > { %1570 = vrsqrt.f32 %v1030_v34  ;;  %vm1038_vm4 = vcmp.eq.f32.partialorder %v1030_v34, inf  ;;  %v1041_v37 = vand.u32 2147483648, %v1030_v34  ;;  %vm1040_vm5 = vcmp.eq.f32.partialorder %v1030_v34, 0.0 }
 0xb79   : > { %v1571_v35 = vpop.eup %1570 }
 0xb7a   : > { %v1037_v36 = vmul.f32 %v1571_v35, %v1030_v34 }
 0xb7c   : > { %v1039_v38 = vsel %vm1038_vm4, %v1030_v34, %v1037_v36 }
 0xb7d   : > { %v1042_v39 = vsel %vm1040_vm5, %v1041_v37, %v1039_v38 }
 0xb7e   : > { %v1043_v40 = vadd.f32 1e-06, %v1042_v39 }
 0xb80   : > { %1572 = vrcp.f32 %v1043_v40 }
 0xb8a   : > { %v1573_v43 = vpop.eup %1572 }
 0xb8b   : > { %v1045_v45 = vmul.f32 %v1573_v43, %v1035_v42 }
 0xb8d   : > { %v1050_v46 = vadd.f32 %v1342_v44, %v1045_v45 }
 0xb8f   : > { %v1051_v47 = vpack.c.bf16 %v1050_v46, %v1050_v46 }
 0xb91   : > { %1479 = vmatmul.mubr.msk.bf16.vlgmr.msra.gmra.mrb[28].mxu1 %vm322_vm1, %v1051_v47 }
 0xc64   : > { %v1109_v51 = vpop.f32.mrb[28].mxu1 }
 0xc65   : > { %v1110_v52 = vadd.f32 %v1343_v50, %v1109_v51  ;;  %v1480_v53 = vpop.f32.mrb[29].mxu1 }
 0xc66   : > { %v1112_v54 = vpop.f32.mrb[30].mxu1 }
 0xc67   : > { %v1115_v55 = vmax.f32 %v1110_v52, 0.0  ;;  %v1481_v56 = vpop.f32.mrb[31].mxu1 }
 0xc69   : > { %v1116_v57 = vpack.c.bf16 %v1115_v55, %v1115_v55 }
 0xc6b   : > { %1491 = vmatmul.mubr.msk.bf16.vlgmr.msra.gmra.mrb[24].mxu0 %vm1153_vm6, %v1116_v57 }
 0xd3e   : > { %v1191_v58 = vpop.f32.mrb[24].mxu0 }
 0xd3f   : > { %v1192_v59 = vadd.f32 %v1347_v1, %v1191_v58  ;;  %v1492_v60 = vpop.f32.mrb[25].mxu0 }
 0xd40   : > { %v1194_v61 = vpop.f32.mrb[26].mxu0 }
 0xd41   : > { %v1493_v18 = vpop.f32.mrb[27].mxu0  ;;  %v1197_v10 = vadd.f32 %v1192_v59, %v1050_v46 }
 0xd43   : > { %v1198_v62 = vsel %vm322_vm1, %v1197_v10, 0.0 }
 0xd44   : > { %1199 = vadd.xlane.f32.xlu1 %v1198_v62 }
 0xdd1   : > { %v1200_v63 = vpop.xlane.xlu1 %1199 }
 0xdd2   : > { %v1201_v0 = vmul.f32 0.03125, %v1200_v63 }
 0xdd4   : > { %v1202_v2 = vsub.f32 %v1197_v10, %v1201_v0 }
 0xdd6   : > { %v1203_v4 = vmul.f32 %v1202_v2, %v1202_v2  ;;  %v1212_v16 = vmul.f32 %v1353_v15, %v1202_v2 }
 0xdd8   : > { %v1204_v5 = vsel %vm322_vm1, %v1203_v4, 0.0 }
 0xdd9   : > { %1205 = vadd.xlane.f32.xlu1 %v1204_v5 }
 0xe66   : > { %v1206_v6 = vpop.xlane.xlu1 %1205 }
 0xe67   : > { %v1207_v7 = vmul.f32 0.032258064, %v1206_v6 }
 0xe69   : > { %1574 = vrsqrt.f32 %v1207_v7  ;;  %vm1215_vm7 = vcmp.eq.f32.partialorder %v1207_v7, inf  ;;  %v1218_v11 = vand.u32 2147483648, %v1207_v7  ;;  %vm1217_vm8 = vcmp.eq.f32.partialorder %v1207_v7, 0.0 }
 0xe73   : > { %v1575_v8 = vpop.eup %1574 }
 0xe74   : > { %v1214_v9 = vmul.f32 %v1575_v8, %v1207_v7 }
 0xe76   : > { %v1216_v12 = vsel %vm1215_vm7, %v1207_v7, %v1214_v9 }
 0xe77   : > { %v1219_v13 = vsel %vm1217_vm8, %v1218_v11, %v1216_v12 }
 0xe78   : > { %v1220_v14 = vadd.f32 1e-06, %v1219_v13 }
 0xe7a   : > { %1576 = vrcp.f32 %v1220_v14 }
 0xe84   : > { %v1577_v17 = vpop.eup %1576 }
 0xe85   : > { %v1222_v20 = vmul.f32 %v1577_v17, %v1212_v16 }
 0xe87   : > { %v1227_v21 = vadd.f32 %v1354_v19, %v1222_v20 }
 0xe89   : > { %1228 = vst.msk [vmem:[%s282_s19] sm:$0xff] %vm322_vm1, %v1227_v21 }
 0xe8a   : > { %1591 = shalt.err (!%p1588_p3)
}
 0xe8b   : > { %s1592_s9 = scalar_lea.hbm %s1940_s23, 128  ;;  %s1596_s17 = scalar_lea.hbm %s1990_s7, 256 }
 0xe8c   : > { %p1593_p4 = scmp.ne.s32.totalorder %s1940_s23, %s1592_s9  ;;  %p1597_p9 = scmp.lt.u32.totalorder %s1940_s23, %s1990_s7 }
 0xe8d   : > { %p1598_p10 = scmp.lt.u32.totalorder %s1596_s17, %s1592_s9  ;;  %p1600_p12 = scmp.lt.u32.totalorder %s1592_s9, %s1940_s23 }
 0xe8e   : > { %p1594_p7 = pnand %p1593_p4, %p1734_p5 }
 0xe8f   : > { %p1599_p11 = por %p1598_p10, %p1597_p9 }
 0xe90   : > { %p1595_p8 = pneg %p1594_p7 }
 0xe91   : > { %p1601_p13 = por %p1600_p12, %p1599_p11 }
 0xe93   : > { %p1602_p0 = pnand %p1601_p13, %p1595_p8 }
 0xe95   : > { %1605 = shalt.err (!%p1602_p0)
}
 0xe96   : > { %1494 = dma.vmem_to_hbm [thread:$0]  (%p1734_p5), %s1942_s20, 128, %s1940_s23, %s1230_s29  }
 0xe97 PF: > { %p1500_p1 = scmp.ge.s32.totalorder %s1640_s27, 2  ;;  %s1255_s21 = sand.u32 1, %s1628_s24  }
 0xe98   : > { %s1256_s22 = scalar_lea.sflag [#allocation3], %s1255_s21 }
 0xe99   : > { %p1497_p2 = pnand %p1500_p1, %p1738_p6 }
 0xe9b   : > { %1623 = dma.done.wait (!%p1497_p2), %s1256_s22, 128  }
 0xe9c   : > { %1625 = vsyncadd (!%p1497_p2), %s1256_s22, 4294967168  ;;  %p17_p3 = scmp.ge.s32.totalorder %s1721_s30, 4   ;;  %s1993_s24 = smov %s1632_s25 }
 0xe9d   : > { %s1994_s25 = smov %s1636_s26  ;;  %s1995_s26 = smov %s1732_s10 }
 0xe9e   : > { %s1996_s27 = smov %s1721_s30  ;;  %19 = sbr.rel (!%p17_p3) target bundleno = 3 (0x3), region = 89 }
 0xea5   :  { %1261 = vsyncpa [#allocation3], 1 }
 0xea6   :  { %1263 = vsyncpa [#allocation3 + $0x1], 1 }

</bundles_post_ra>
